<compile_context>
chip_gen: v7x
topology: tpu7x:2x2x1
jax: 0.10.0
libtpu: 0.0.40
codegen_flags: <defaults>
</compile_context>

<pallas_src>
import jax
import jax.numpy as jnp
from jax import lax
from jax.experimental import pallas as pl
from jax.experimental.pallas import tpu as pltpu

INPUT_DIM = 3
HIDDEN_DIM = 128
TIME_EMBED_DIM = 32
CHUNK = 256                 # batch columns per in-kernel chunk (= MXU N width on v6e/v7x)
MAX_CHUNKS_PER_TILE = 16    # <= 4096 batch rows per grid step (safe on all VMEM gens)


def _silu(v):
    # Exact SiLU v*sigmoid(v) in tanh form: one EUP op per element, f32 math.
    return 0.5 * v * (1.0 + jnp.tanh(0.5 * v))


def _make_kernel(chunks_per_tile):
    def kernel(x_ref, t_ref, wt1_ref, bt1_ref, w1x_ref, wht_ref, bfold_ref,
               w2_ref, b2_ref, w3_ref, b3_ref, o_ref):
        # x_ref: (C, 3, CHUNK) f32, t_ref: (C, 1, CHUNK) f32, o_ref: (C, 3, CHUNK) f32
        def compute(c):
            xc = x_ref[c]                                    # (3, CHUNK)  f32
            tc = t_ref[c]                                    # (1, CHUNK)  f32

            # time_embed Linear(1, 32) + SiLU: K=1 -> VPU broadcast FMA (no MXU).
            h = _silu(wt1_ref[...] * tc + bt1_ref[...])      # (32, CHUNK) f32

            # fc1 with the 2nd time-embed Linear folded in, entirely on the MXU:
            #   h1^T = (Wt2 @ W1t)^T @ silu(h)^T + W1x^T @ x^T + b_fold^T
            h1 = jnp.dot(wht_ref[...], h.astype(jnp.bfloat16),
                         preferred_element_type=jnp.float32)
            h1 = h1 + jnp.dot(w1x_ref[...], xc.astype(jnp.bfloat16),
                              preferred_element_type=jnp.float32)
            h1 = _silu(h1 + bfold_ref[...])                  # (128, CHUNK) f32

            # fc2: batch on the N/lane dim -> full-width MXU, f32 accumulation.
            h2 = _silu(jnp.dot(w2_ref[...], h1.astype(jnp.bfloat16),
                               preferred_element_type=jnp.float32) + b2_ref[...])

            # fc3 (no activation): M=3 on the MXU; lane-dense (3, CHUNK) store.
            oc = jnp.dot(w3_ref[...], h2.astype(jnp.bfloat16),
                         preferred_element_type=jnp.float32) + b3_ref[...]
            o_ref[c] = oc.astype(o_ref.dtype)

        if chunks_per_tile == 1:
            compute(0)
        else:
            def body(c, carry):
                compute(c)
                return carry
            # fori_loop (not a Python for) bounds live ranges to one chunk;
            # unroll short trip counts for LLO scheduling visibility.
            lax.fori_loop(0, chunks_per_tile, body, 0,
                          unroll=chunks_per_tile <= 4)
    return kernel


def init_params(key, input_dim=INPUT_DIM, hidden_dim=HIDDEN_DIM,
                time_embed_dim=TIME_EMBED_DIM):
    """PyTorch-style uniform(+/- 1/sqrt(fan_in)) init; weights stored as (in, out)."""
    def linear(k, fan_in, fan_out):
        kw, kb = jax.random.split(k)
        bound = 1.0 / jnp.sqrt(fan_in)
        w = jax.random.uniform(kw, (fan_in, fan_out), jnp.float32, -bound, bound)
        b = jax.random.uniform(kb, (1, fan_out), jnp.float32, -bound, bound)
        return w, b

    k1, k2, k3, k4, k5 = jax.random.split(key, 5)
    wt1, bt1 = linear(k1, 1, time_embed_dim)
    wt2, bt2 = linear(k2, time_embed_dim, time_embed_dim)
    w1, b1 = linear(k3, input_dim + time_embed_dim, hidden_dim)
    w2, b2 = linear(k4, hidden_dim, hidden_dim)
    w3, b3 = linear(k5, hidden_dim, input_dim)
    return dict(wt1=wt1, bt1=bt1, wt2=wt2, bt2=bt2,
                w1x=w1[:input_dim], w1t=w1[input_dim:], b1=b1,
                w2=w2, b2=b2, w3=w3, b3=b3)


def pack_params(p):
    """Transpose weights for feature-major compute, fold time_embed's 2nd Linear
    into fc1 (exact, done in f32), cast MXU operands to bf16."""
    wht = p["wt2"] @ p["w1t"]                    # (32, 128)
    bfold = p["b1"] + p["bt2"] @ p["w1t"]        # (1, 128)
    f32, bf16 = jnp.float32, jnp.bfloat16
    return dict(
        wt1_t=p["wt1"].T.astype(f32),            # (32, 1)   VPU path, f32
        bt1_t=p["bt1"].T.astype(f32),            # (32, 1)
        w1x_t=p["w1x"].T.astype(bf16),           # (128, 3)  MXU LHS
        wht_t=wht.T.astype(bf16),                # (128, 32) MXU LHS
        bfold_t=bfold.T.astype(f32),             # (128, 1)
        w2_t=p["w2"].T.astype(bf16),             # (128, 128)
        b2_t=p["b2"].T.astype(f32),              # (128, 1)
        w3_t=p["w3"].T.astype(bf16),             # (3, 128)
        b3_t=p["b3"].T.astype(f32),              # (3, 1)
    )


def _round_up(n, m):
    return ((n + m - 1) // m) * m


def mlp_score_forward(x, t, kparams, *, chunk=CHUNK,
                      max_chunks_per_tile=MAX_CHUNKS_PER_TILE,
                      core_parallel=False):
    """x: (B, INPUT_DIM), t: (B,)  ->  (B, INPUT_DIM) f32 (MLPScoreModel.forward)."""
    B = x.shape[0]
    x = x.astype(jnp.float32)
    t = t.astype(jnp.float32).reshape(B)

    # Pad batch to a chunk multiple (<= chunk-1 zero rows; sliced off at the end),
    # then lay it out feature-major per chunk: (n_chunks, feat, chunk), batch on lanes.
    b_pad = _round_up(B, chunk)
    if b_pad != B:
        x = jnp.pad(x, ((0, b_pad - B), (0, 0)))
        t = jnp.pad(t, ((0, b_pad - B),))
    n_chunks = b_pad // chunk
    x3 = jnp.transpose(x.reshape(n_chunks, chunk, INPUT_DIM), (0, 2, 1))  # (n, 3, chunk)
    t3 = t.reshape(n_chunks, 1, chunk)                                    # (n, 1, chunk)

    cpt = min(max_chunks_per_tile, n_chunks)       # chunks per grid step
    grid = (pl.cdiv(n_chunks, cpt),)

    def io_spec(feat):
        return pl.BlockSpec((cpt, feat, chunk), lambda i: (i, 0, 0))

    def resident_spec(a):                          # weights: full VMEM-resident block
        return pl.BlockSpec(a.shape, lambda i: (0, 0))

    weights = (kparams["wt1_t"], kparams["bt1_t"], kparams["w1x_t"],
               kparams["wht_t"], kparams["bfold_t"], kparams["w2_t"],
               kparams["b2_t"], kparams["w3_t"], kparams["b3_t"])

    # "parallel" batch axis; on v7x (2 TCs) set core_parallel=True for CORE_PARALLEL.
    sem = pltpu.CORE_PARALLEL if core_parallel else "parallel"

    o3 = pl.pallas_call(
        _make_kernel(cpt),
        out_shape=jax.ShapeDtypeStruct((n_chunks, INPUT_DIM, chunk), jnp.float32),
        grid=grid,
        in_specs=[io_spec(INPUT_DIM), io_spec(1)] + [resident_spec(w) for w in weights],
        out_specs=io_spec(INPUT_DIM),
        compiler_params=pltpu.CompilerParams(
            dimension_semantics=(sem,),
            vmem_limit_bytes=32 * 1024 * 1024,     # footprint ~1 MiB; portable cap
        ),
    )(x3, t3, *weights)

    out = jnp.transpose(o3, (0, 2, 1)).reshape(b_pad, INPUT_DIM)
    return out[:B]


def _reference_forward(x, t, params):
    """Pure-JAX f32 reference matching the PyTorch module exactly."""
    def silu(v):
        return v * jax.nn.sigmoid(v)
    t2d = t.astype(jnp.float32).reshape(-1, 1)
    h = silu(t2d @ params["wt1"] + params["bt1"])
    te = h @ params["wt2"] + params["bt2"]
    xc = jnp.concatenate([x, te], axis=-1)
    w1 = jnp.concatenate([params["w1x"], params["w1t"]], axis=0)
    h1 = silu(xc @ w1 + params["b1"])
    h2 = silu(h1 @ params["w2"] + params["b2"])
    return h2 @ params["w3"] + params["b3"]


if __name__ == "__main__":
    key = jax.random.PRNGKey(0)
    kp, kx, kt = jax.random.split(key, 3)

    params = init_params(kp)
    kparams = pack_params(params)

    # Single padded chunk, multi-chunk, and padded multi-chunk batch sizes.
    for B in (16, 512, 600):
        xb = jax.random.normal(jax.random.fold_in(kx, B), (B, INPUT_DIM), jnp.float32)
        tb = jax.random.uniform(jax.random.fold_in(kt, B), (B,), jnp.float32)

        out = jax.block_until_ready(mlp_score_forward(xb, tb, kparams))
        ref = _reference_forward(xb, tb, params)

        assert out.shape == (B, INPUT_DIM)
        # bf16 MXU operands with f32 accumulation; exact tanh-form SiLU elsewhere.
        assert jnp.allclose(out, ref, atol=1e-2, rtol=1e-2), f"mismatch at B={B}"

    print("KERNEL_OK")
</pallas_src>

<mosaic_0001>
module attributes {stable_mosaic.version = 11 : i64} {
  func.func @kernel(%arg0: i32, %arg1: memref<1x3x256xf32, #tpu.memory_space<vmem>>, %arg2: memref<1x1x256xf32, #tpu.memory_space<vmem>>, %arg3: memref<32x1xf32, #tpu.memory_space<vmem>>, %arg4: memref<32x1xf32, #tpu.memory_space<vmem>>, %arg5: memref<128x3xbf16, #tpu.memory_space<vmem>>, %arg6: memref<128x32xbf16, #tpu.memory_space<vmem>>, %arg7: memref<128x1xf32, #tpu.memory_space<vmem>>, %arg8: memref<128x128xbf16, #tpu.memory_space<vmem>>, %arg9: memref<128x1xf32, #tpu.memory_space<vmem>>, %arg10: memref<3x128xbf16, #tpu.memory_space<vmem>>, %arg11: memref<3x1xf32, #tpu.memory_space<vmem>>, %arg12: memref<1x3x256xf32, #tpu.memory_space<vmem>>) attributes {dimension_semantics = [#tpu.dimension_semantics<parallel>], iteration_bounds = array<i64: 1>, scalar_prefetch = 0 : i64, scratch_operands = 0 : i64, tpu.core_type = #tpu.core_type<tc>, window_params = [{transform_indices = @transform_0, window_bounds = array<i64: 1, 3, 256>}, {transform_indices = @transform_1, window_bounds = array<i64: 1, 1, 256>}, {pipeline_mode = #tpu.pipeline_mode<synchronous>, transform_indices = @transform_2, window_bounds = array<i64: 32, 1>}, {pipeline_mode = #tpu.pipeline_mode<synchronous>, transform_indices = @transform_3, window_bounds = array<i64: 32, 1>}, {pipeline_mode = #tpu.pipeline_mode<synchronous>, transform_indices = @transform_4, window_bounds = array<i64: 128, 3>}, {pipeline_mode = #tpu.pipeline_mode<synchronous>, transform_indices = @transform_5, window_bounds = array<i64: 128, 32>}, {pipeline_mode = #tpu.pipeline_mode<synchronous>, transform_indices = @transform_6, window_bounds = array<i64: 128, 1>}, {pipeline_mode = #tpu.pipeline_mode<synchronous>, transform_indices = @transform_7, window_bounds = array<i64: 128, 128>}, {pipeline_mode = #tpu.pipeline_mode<synchronous>, transform_indices = @transform_8, window_bounds = array<i64: 128, 1>}, {pipeline_mode = #tpu.pipeline_mode<synchronous>, transform_indices = @transform_9, window_bounds = array<i64: 3, 128>}, {pipeline_mode = #tpu.pipeline_mode<synchronous>, transform_indices = @transform_10, window_bounds = array<i64: 3, 1>}, {transform_indices = @transform_11, window_bounds = array<i64: 1, 3, 256>}]} {
    %c0 = arith.constant 0 : index
    %c0_0 = arith.constant 0 : index
    %c0_1 = arith.constant 0 : index
    %0 = vector.load %arg1[%c0, %c0_0, %c0_1] : memref<1x3x256xf32, #tpu.memory_space<vmem>>, vector<1x3x256xf32>
    %1 = vector.shape_cast %0 : vector<1x3x256xf32> to vector<3x256xf32>
    %c0_2 = arith.constant 0 : index
    %c0_3 = arith.constant 0 : index
    %c0_4 = arith.constant 0 : index
    %2 = vector.load %arg2[%c0_2, %c0_3, %c0_4] : memref<1x1x256xf32, #tpu.memory_space<vmem>>, vector<1x1x256xf32>
    %3 = vector.shape_cast %2 : vector<1x1x256xf32> to vector<1x256xf32>
    %c0_5 = arith.constant 0 : index
    %c0_6 = arith.constant 0 : index
    %4 = vector.load %arg3[%c0_5, %c0_6] : memref<32x1xf32, #tpu.memory_space<vmem>>, vector<32x1xf32>
    %5 = vector.broadcast %4 : vector<32x1xf32> to vector<32x256xf32>
    %6 = vector.broadcast %3 : vector<1x256xf32> to vector<32x256xf32>
    %7 = arith.mulf %5, %6 : vector<32x256xf32>
    %c0_7 = arith.constant 0 : index
    %c0_8 = arith.constant 0 : index
    %8 = vector.load %arg4[%c0_7, %c0_8] : memref<32x1xf32, #tpu.memory_space<vmem>>, vector<32x1xf32>
    %9 = vector.broadcast %8 : vector<32x1xf32> to vector<32x256xf32>
    %10 = arith.addf %7, %9 : vector<32x256xf32>
    %cst = arith.constant 5.000000e-01 : f32
    %11 = vector.broadcast %cst : f32 to vector<32x256xf32>
    %12 = arith.mulf %11, %10 : vector<32x256xf32>
    %cst_9 = arith.constant 5.000000e-01 : f32
    %13 = vector.broadcast %cst_9 : f32 to vector<32x256xf32>
    %14 = arith.mulf %13, %10 : vector<32x256xf32>
    %15 = math.tanh %14 : vector<32x256xf32>
    %cst_10 = arith.constant 1.000000e+00 : f32
    %16 = vector.broadcast %cst_10 : f32 to vector<32x256xf32>
    %17 = arith.addf %16, %15 : vector<32x256xf32>
    %18 = arith.mulf %12, %17 : vector<32x256xf32>
    %c0_11 = arith.constant 0 : index
    %c0_12 = arith.constant 0 : index
    %19 = vector.load %arg6[%c0_11, %c0_12] : memref<128x32xbf16, #tpu.memory_space<vmem>>, vector<128x32xbf16>
    %20 = arith.truncf %18 : vector<32x256xf32> to vector<32x256xbf16>
    %cst_13 = arith.constant dense<0.000000e+00> : vector<128x256xf32>
    %21 = tpu.matmul %19, %20, %cst_13 {dimension_numbers = #tpu.dot_dimension_numbers<[1], [0], [0], [1], [0, 0, 1, 1], [], []>} : vector<128x32xbf16>, vector<32x256xbf16>, vector<128x256xf32> -> vector<128x256xf32>
    %c0_14 = arith.constant 0 : index
    %c0_15 = arith.constant 0 : index
    %22 = vector.load %arg5[%c0_14, %c0_15] : memref<128x3xbf16, #tpu.memory_space<vmem>>, vector<128x3xbf16>
    %23 = arith.truncf %1 : vector<3x256xf32> to vector<3x256xbf16>
    %cst_16 = arith.constant dense<0.000000e+00> : vector<128x256xf32>
    %24 = tpu.matmul %22, %23, %cst_16 {dimension_numbers = #tpu.dot_dimension_numbers<[1], [0], [0], [1], [0, 0, 1, 1], [], []>} : vector<128x3xbf16>, vector<3x256xbf16>, vector<128x256xf32> -> vector<128x256xf32>
    %25 = arith.addf %21, %24 : vector<128x256xf32>
    %c0_17 = arith.constant 0 : index
    %c0_18 = arith.constant 0 : index
    %26 = vector.load %arg7[%c0_17, %c0_18] : memref<128x1xf32, #tpu.memory_space<vmem>>, vector<128x1xf32>
    %27 = vector.broadcast %26 : vector<128x1xf32> to vector<128x256xf32>
    %28 = arith.addf %25, %27 : vector<128x256xf32>
    %cst_19 = arith.constant 5.000000e-01 : f32
    %29 = vector.broadcast %cst_19 : f32 to vector<128x256xf32>
    %30 = arith.mulf %29, %28 : vector<128x256xf32>
    %cst_20 = arith.constant 5.000000e-01 : f32
    %31 = vector.broadcast %cst_20 : f32 to vector<128x256xf32>
    %32 = arith.mulf %31, %28 : vector<128x256xf32>
    %33 = math.tanh %32 : vector<128x256xf32>
    %cst_21 = arith.constant 1.000000e+00 : f32
    %34 = vector.broadcast %cst_21 : f32 to vector<128x256xf32>
    %35 = arith.addf %34, %33 : vector<128x256xf32>
    %36 = arith.mulf %30, %35 : vector<128x256xf32>
    %c0_22 = arith.constant 0 : index
    %c0_23 = arith.constant 0 : index
    %37 = vector.load %arg8[%c0_22, %c0_23] : memref<128x128xbf16, #tpu.memory_space<vmem>>, vector<128x128xbf16>
    %38 = arith.truncf %36 : vector<128x256xf32> to vector<128x256xbf16>
    %cst_24 = arith.constant dense<0.000000e+00> : vector<128x256xf32>
    %39 = tpu.matmul %37, %38, %cst_24 {dimension_numbers = #tpu.dot_dimension_numbers<[1], [0], [0], [1], [0, 0, 1, 1], [], []>} : vector<128x128xbf16>, vector<128x256xbf16>, vector<128x256xf32> -> vector<128x256xf32>
    %c0_25 = arith.constant 0 : index
    %c0_26 = arith.constant 0 : index
    %40 = vector.load %arg9[%c0_25, %c0_26] : memref<128x1xf32, #tpu.memory_space<vmem>>, vector<128x1xf32>
    %41 = vector.broadcast %40 : vector<128x1xf32> to vector<128x256xf32>
    %42 = arith.addf %39, %41 : vector<128x256xf32>
    %cst_27 = arith.constant 5.000000e-01 : f32
    %43 = vector.broadcast %cst_27 : f32 to vector<128x256xf32>
    %44 = arith.mulf %43, %42 : vector<128x256xf32>
    %cst_28 = arith.constant 5.000000e-01 : f32
    %45 = vector.broadcast %cst_28 : f32 to vector<128x256xf32>
    %46 = arith.mulf %45, %42 : vector<128x256xf32>
    %47 = math.tanh %46 : vector<128x256xf32>
    %cst_29 = arith.constant 1.000000e+00 : f32
    %48 = vector.broadcast %cst_29 : f32 to vector<128x256xf32>
    %49 = arith.addf %48, %47 : vector<128x256xf32>
    %50 = arith.mulf %44, %49 : vector<128x256xf32>
    %c0_30 = arith.constant 0 : index
    %c0_31 = arith.constant 0 : index
    %51 = vector.load %arg10[%c0_30, %c0_31] : memref<3x128xbf16, #tpu.memory_space<vmem>>, vector<3x128xbf16>
    %52 = arith.truncf %50 : vector<128x256xf32> to vector<128x256xbf16>
    %cst_32 = arith.constant dense<0.000000e+00> : vector<3x256xf32>
    %53 = tpu.matmul %51, %52, %cst_32 {dimension_numbers = #tpu.dot_dimension_numbers<[1], [0], [0], [1], [0, 0, 1, 1], [], []>} : vector<3x128xbf16>, vector<128x256xbf16>, vector<3x256xf32> -> vector<3x256xf32>
    %c0_33 = arith.constant 0 : index
    %c0_34 = arith.constant 0 : index
    %54 = vector.load %arg11[%c0_33, %c0_34] : memref<3x1xf32, #tpu.memory_space<vmem>>, vector<3x1xf32>
    %55 = vector.broadcast %54 : vector<3x1xf32> to vector<3x256xf32>
    %56 = arith.addf %53, %55 : vector<3x256xf32>
    %c0_35 = arith.constant 0 : index
    %c0_36 = arith.constant 0 : index
    %c0_37 = arith.constant 0 : index
    %57 = vector.load %arg12[%c0_35, %c0_36, %c0_37] : memref<1x3x256xf32, #tpu.memory_space<vmem>>, vector<1x3x256xf32>
    %58 = vector.shape_cast %57 : vector<1x3x256xf32> to vector<3x256xf32>
    %59 = vector.shape_cast %56 : vector<3x256xf32> to vector<1x3x256xf32>
    tpu.vector_store %arg12[%c0_35, %c0_36, %c0_37], %59 {strides = array<i32>} : memref<1x3x256xf32, #tpu.memory_space<vmem>>, vector<1x3x256xf32>,
    return
  }
  func.func @transform_0(%arg0: i32) -> (i32, i32, i32) {
    %c0_i32 = arith.constant 0 : i32
    %c0_i32_0 = arith.constant 0 : i32
    %c0_i32_1 = arith.constant 0 : i32
    return %arg0, %c0_i32, %c0_i32_0 : i32, i32, i32
  }
  func.func @transform_1(%arg0: i32) -> (i32, i32, i32) {
    %c0_i32 = arith.constant 0 : i32
    %c0_i32_0 = arith.constant 0 : i32
    %c0_i32_1 = arith.constant 0 : i32
    return %arg0, %c0_i32, %c0_i32_0 : i32, i32, i32
  }
  func.func @transform_2(%arg0: i32) -> (i32, i32) {
    %c0_i32 = arith.constant 0 : i32
    %c0_i32_0 = arith.constant 0 : i32
    %c0_i32_1 = arith.constant 0 : i32
    return %c0_i32, %c0_i32_0 : i32, i32
  }
  func.func @transform_3(%arg0: i32) -> (i32, i32) {
    %c0_i32 = arith.constant 0 : i32
    %c0_i32_0 = arith.constant 0 : i32
    %c0_i32_1 = arith.constant 0 : i32
    return %c0_i32, %c0_i32_0 : i32, i32
  }
  func.func @transform_4(%arg0: i32) -> (i32, i32) {
    %c0_i32 = arith.constant 0 : i32
    %c0_i32_0 = arith.constant 0 : i32
    %c0_i32_1 = arith.constant 0 : i32
    return %c0_i32, %c0_i32_0 : i32, i32
  }
  func.func @transform_5(%arg0: i32) -> (i32, i32) {
    %c0_i32 = arith.constant 0 : i32
    %c0_i32_0 = arith.constant 0 : i32
    %c0_i32_1 = arith.constant 0 : i32
    return %c0_i32, %c0_i32_0 : i32, i32
  }
  func.func @transform_6(%arg0: i32) -> (i32, i32) {
    %c0_i32 = arith.constant 0 : i32
    %c0_i32_0 = arith.constant 0 : i32
    %c0_i32_1 = arith.constant 0 : i32
    return %c0_i32, %c0_i32_0 : i32, i32
  }
  func.func @transform_7(%arg0: i32) -> (i32, i32) {
    %c0_i32 = arith.constant 0 : i32
    %c0_i32_0 = arith.constant 0 : i32
    %c0_i32_1 = arith.constant 0 : i32
    return %c0_i32, %c0_i32_0 : i32, i32
  }
  func.func @transform_8(%arg0: i32) -> (i32, i32) {
    %c0_i32 = arith.constant 0 : i32
    %c0_i32_0 = arith.constant 0 : i32
    %c0_i32_1 = arith.constant 0 : i32
    return %c0_i32, %c0_i32_0 : i32, i32
  }
  func.func @transform_9(%arg0: i32) -> (i32, i32) {
    %c0_i32 = arith.constant 0 : i32
    %c0_i32_0 = arith.constant 0 : i32
    %c0_i32_1 = arith.constant 0 : i32
    return %c0_i32, %c0_i32_0 : i32, i32
  }
  func.func @transform_10(%arg0: i32) -> (i32, i32) {
    %c0_i32 = arith.constant 0 : i32
    %c0_i32_0 = arith.constant 0 : i32
    %c0_i32_1 = arith.constant 0 : i32
    return %c0_i32, %c0_i32_0 : i32, i32
  }
  func.func @transform_11(%arg0: i32) -> (i32, i32, i32) {
    %c0_i32 = arith.constant 0 : i32
    %c0_i32_0 = arith.constant 0 : i32
    %c0_i32_1 = arith.constant 0 : i32
    return %arg0, %c0_i32, %c0_i32_0 : i32, i32, i32
  }
}

</mosaic_0001>

<bundles_post_ra>
// kernel: tpu_custom_call.1
= control target key start
LH: loop header
LB: loop body
LE: loop exit
PB: predicated region body
PF: predicated region fallthrough
CT: control target
= control target key end

     0   :  { %v1546_v0 = vmov 0   ;;  %vm254_vm0 = vcmask 1040384   ;;  %vm255_vm1 = vcmask 1041408   ;;  %v1547_v9 = vmov 65535   ;;  %s1974_s3 = inlined_call_operand.vmem [shape: f32[32,1], index: 3, kind: input, shape index: {}]   ;;  %s1975_s2 = inlined_call_operand.vmem [shape: f32[32,1], index: 2, kind: input, shape index: {}]   ;;  %s1976_s6 = inlined_call_operand.vmem [shape: f32[128,1], index: 6, kind: input, shape index: {}]   ;;  %s1977_s0 = inlined_call_operand.vmem [shape: f32[1,3,256], index: 0, kind: input, shape index: {}]   ;;  %s1978_s4 = inlined_call_operand.vmem [shape: bf16[128,3], index: 4, kind: input, shape index: {}]   ;;  %s1979_s5 = inlined_call_operand.vmem [shape: bf16[128,32], index: 5, kind: input, shape index: {}]   ;;  %s1980_s8 = inlined_call_operand.vmem [shape: f32[128,1], index: 8, kind: input, shape index: {}]   ;;  %s1981_s10 = inlined_call_operand.vmem [shape: f32[3,1], index: 10, kind: input, shape index: {}]   ;;  %s1982_s1 = inlined_call_operand.vmem [shape: f32[1,1,256], index: 1, kind: input, shape index: {}]   ;;  %s1983_s7 = inlined_call_operand.vmem [shape: bf16[128,128], index: 7, kind: input, shape index: {}]   ;;  %s1984_s9 = inlined_call_operand.vmem [shape: bf16[3,128], index: 9, kind: input, shape index: {}]   ;;  %s1985_s11 = inlined_call_operand.vmem [shape: f32[1,3,256], index: 11, kind: output, shape index: {}]  }
   0x1   :  { %1376 = vset.pattern.permute.xlu1 %v1546_v0  ;;  %1375 = vset.pattern.permute.xlu0 %v1546_v0  ;;  %v84_v1 = vld [vmem:[%s1974_s3] sm:$0xff]  ;;  %v85_v3 = vld [vmem:[%s1974_s3 + $0x8] sm:$0xff]  ;;  %v44_v5 = vld [vmem:[%s1975_s2 + $0x18] sm:$0xff]  ;;  %v256_v10 = vsel %vm254_vm0, 4294967295, %v1547_v9  ;;  %vm229_vm2 = vcmask 23552   ;;  %v66_v59 = vlaneseq  ;;  %vm417_vm3 = vcmask 261120  }
   0x2   :  { %v41_v2 = vld [vmem:[%s1975_s2] sm:$0xff]  ;;  %90 = vperm.xlu1 %1376, %v84_v1   ;;  %v42_v4 = vld [vmem:[%s1975_s2 + $0x8] sm:$0xff]  ;;  %296 = vmatprep.mubr.bf16.mxu0 %v1546_v0  ;;  %v43_v6 = vld [vmem:[%s1975_s2 + $0x10] sm:$0xff]  ;;  %v257_v16 = vsel %vm255_vm1, %v256_v10, 0 }
   0x3   :  { %47 = vperm.xlu0 %1375, %v41_v2   ;;  %1019 = vmatprep.mubr.bf16.mxu1 %v1546_v0  ;;  %v87_v7 = vld [vmem:[%s1974_s3 + $0x18] sm:$0xff]  ;;  %v86_v8 = vld [vmem:[%s1974_s3 + $0x10] sm:$0xff]  ;;  %v556_v11 = vld [vmem:[%s1976_s6 + $0x8] sm:$0xff]  ;;  %v67_v60 = vshrl.u32 %v66_v59, 7 }
   0x4   :  { %v39_v12 = vld [vmem:[%s1977_s0] sm:$0x77]  ;;  %v558_v18 = vld [vmem:[%s1976_s6 + $0x18] sm:$0xff]  ;;  %v557_v19 = vld [vmem:[%s1976_s6 + $0x10] sm:$0xff] }
   0x5   :  { %v555_v13 = vld [vmem:[%s1976_s6] sm:$0xff]  ;;  %v185_v14 = vcombine.high %v39_v12, %v39_v12  ;;  %v187_v15 = vpack.c.bf16 %v39_v12, %v39_v12  ;;  %v560_v22 = vld [vmem:[%s1976_s6 + $0x28] sm:$0xff]  ;;  %v562_v25 = vld [vmem:[%s1976_s6 + $0x38] sm:$0xff]  ;;  %v68_v61 = vsub.s32 0, %v67_v60  ;;  %v72_v62 = vsub.s32 1, %v67_v60 }
   0x6   :  { %95 = vperm.xlu1 %1376, %v85_v3   ;;  %v559_v23 = vld [vmem:[%s1976_s6 + $0x20] sm:$0xff]  ;;  %v561_v26 = vld [vmem:[%s1976_s6 + $0x30] sm:$0xff]  ;;  %v564_v27 = vld [vmem:[%s1976_s6 + $0x48] sm:$0xff] }
   0x7   :  { %52 = vperm.xlu0 %1375, %v42_v4   ;;  %v188_v17 = vpack.c.bf16 %v185_v14, %v185_v14  ;;  %v259_v21 = vand.u32 %v257_v16, %v187_v15  ;;  %v1378_v24 = vld [vmem:[%s1978_s4] sm:$0xff]   ;;  %v1379_v29 = vld [vmem:[%s1978_s4 + $0x8] sm:$0xff]   ;;  %v566_v30 = vld [vmem:[%s1976_s6 + $0x58] sm:$0xff] }
   0x8   :  { %v563_v28 = vld [vmem:[%s1976_s6 + $0x40] sm:$0xff]  ;;  %v565_v31 = vld [vmem:[%s1976_s6 + $0x50] sm:$0xff]  ;;  %v568_v32 = vld [vmem:[%s1976_s6 + $0x68] sm:$0xff] }
   0x9   :  { %v262_v20 = vand.u32 %v257_v16, %v188_v17  ;;  %v567_v33 = vld [vmem:[%s1976_s6 + $0x60] sm:$0xff]  ;;  %v1380_v34 = vld [vmem:[%s1978_s4 + $0x10] sm:$0xff]   ;;  %v570_v35 = vld [vmem:[%s1976_s6 + $0x78] sm:$0xff] }
   0xa   :  { %62 = vperm.xlu1 %1376, %v44_v5   ;;  %v569_v36 = vld [vmem:[%s1976_s6 + $0x70] sm:$0xff]  ;;  %v844_v37 = vld [vmem:[%s1980_s8 + $0x8] sm:$0xff]  ;;  %v843_v38 = vld [vmem:[%s1980_s8] sm:$0xff] }
   0xb   :  { %57 = vperm.xlu0 %1375, %v43_v6   ;;  %264 = vmatprep.subr.bf16.mxu0 %v262_v20  ;;  %v1381_v39 = vld [vmem:[%s1978_s4 + $0x18] sm:$0xff]   ;;  %v845_v41 = vld [vmem:[%s1980_s8 + $0x10] sm:$0xff]  ;;  %v848_v42 = vld [vmem:[%s1980_s8 + $0x28] sm:$0xff] }
   0xc   :  { %265 = vmatpush1.bf16.msra.mxu0 %v259_v21  ;;  %v846_v40 = vld [vmem:[%s1980_s8 + $0x18] sm:$0xff]  ;;  %v847_v43 = vld [vmem:[%s1980_s8 + $0x20] sm:$0xff]  ;;  %v849_v46 = vld [vmem:[%s1980_s8 + $0x30] sm:$0xff] }
   0xd   :  { %v1382_v44 = vld [vmem:[%s1978_s4 + $0x20] sm:$0xff]   ;;  %v850_v45 = vld [vmem:[%s1980_s8 + $0x38] sm:$0xff]  ;;  %v852_v47 = vld [vmem:[%s1980_s8 + $0x48] sm:$0xff] }
   0xe   :  { %105 = vperm.xlu1 %1376, %v87_v7   ;;  %v851_v48 = vld [vmem:[%s1980_s8 + $0x40] sm:$0xff]  ;;  %v1383_v49 = vld [vmem:[%s1978_s4 + $0x28] sm:$0xff]   ;;  %v854_v50 = vld [vmem:[%s1980_s8 + $0x58] sm:$0xff] }
   0xf   :  { %100 = vperm.xlu0 %1375, %v86_v8   ;;  %1309 = vmatmul.mubr.msk.bf16.vlgmr.msra.gmra.mrb[0].mxu0 %vm229_vm2, %v1378_v24  ;;  %v853_v51 = vld [vmem:[%s1980_s8 + $0x50] sm:$0xff]  ;;  %v856_v52 = vld [vmem:[%s1980_s8 + $0x68] sm:$0xff]  ;;  %v855_v53 = vld [vmem:[%s1980_s8 + $0x60] sm:$0xff] }
  0x10   :  { %306 = vmatprep.mubr.bf16.mxu0 %v1546_v0  ;;  %v1384_v54 = vld [vmem:[%s1978_s4 + $0x30] sm:$0xff]   ;;  %v858_v55 = vld [vmem:[%s1980_s8 + $0x78] sm:$0xff]  ;;  %v1245_v57 = vld [vmem:[%s1981_s10] sm:$0x7] }
  0x11   :  { %v857_v56 = vld [vmem:[%s1980_s8 + $0x70] sm:$0xff]  ;;  %v1385_v58 = vld [vmem:[%s1978_s4 + $0x38] sm:$0xff]   ;;  %v40_v63 = vld [vmem:[%s1982_s1] sm:$0x3] }
  0x12   :  { %578 = vperm.xlu1 %1376, %v556_v11   ;;  %v69_v1 = vrot.slane %v40_v63, %v68_v61  ;;  %v73_v2 = vrot.slane %v40_v63, %v72_v62  ;;  %v1386_v63 = vld [vmem:[%s1979_s5] sm:$0xff]  }
  0x13   :  { %573 = vperm.xlu0 %1375, %v555_v13  }
  0x16   :  { %588 = vperm.xlu1 %1376, %v558_v18  }
  0x17   :  { %583 = vperm.xlu0 %1375, %v557_v19   ;;  %1310 = vmatmul.mubr.msk.bf16.gmra.mrb[4].mxu0 %vm229_vm2, %v1379_v29 }
  0x18   :  { %316 = vmatprep.mubr.bf16.mxu0 %v1546_v0 }
  0x1a   :  { %598 = vperm.xlu1 %1376, %v560_v22  }
  0x1b   :  { %593 = vperm.xlu0 %1375, %v559_v23  }
  0x1e   :  { %608 = vperm.xlu1 %1376, %v562_v25  }
  0x1f   :  { %603 = vperm.xlu0 %1375, %v561_v26   ;;  %1311 = vmatmul.mubr.msk.bf16.gmra.mrb[8].mxu0 %vm229_vm2, %v1380_v34 }
  0x20   :  { %326 = vmatprep.mubr.bf16.mxu0 %v1546_v0 }
  0x22   :  { %618 = vperm.xlu1 %1376, %v564_v27  }
  0x23   :  { %613 = vperm.xlu0 %1375, %v563_v28  }
  0x26   :  { %628 = vperm.xlu1 %1376, %v566_v30  }
  0x27   :  { %623 = vperm.xlu0 %1375, %v565_v31   ;;  %1312 = vmatmul.mubr.msk.bf16.gmra.mrb[12].mxu0 %vm229_vm2, %v1381_v39 }
  0x28   :  { %336 = vmatprep.mubr.bf16.mxu0 %v1546_v0 }
  0x2a   :  { %638 = vperm.xlu1 %1376, %v568_v32  }
  0x2b   :  { %633 = vperm.xlu0 %1375, %v567_v33  }
  0x2e   :  { %648 = vperm.xlu1 %1376, %v570_v35  }
  0x2f   :  { %643 = vperm.xlu0 %1375, %v569_v36   ;;  %1313 = vmatmul.mubr.msk.bf16.gmra.mrb[16].mxu0 %vm229_vm2, %v1382_v44 }
  0x30   :  { %346 = vmatprep.mubr.bf16.mxu0 %v1546_v0 }
  0x32   :  { %866 = vperm.xlu1 %1376, %v844_v37  }
  0x33   :  { %861 = vperm.xlu0 %1375, %v843_v38  }
  0x36   :  { %876 = vperm.xlu1 %1376, %v846_v40  }
  0x37   :  { %871 = vperm.xlu0 %1375, %v845_v41   ;;  %1314 = vmatmul.mubr.msk.bf16.gmra.mrb[20].mxu0 %vm229_vm2, %v1383_v49 }
  0x38   :  { %356 = vmatprep.mubr.bf16.mxu0 %v1546_v0 }
  0x3a   :  { %886 = vperm.xlu1 %1376, %v848_v42  }
  0x3b   :  { %881 = vperm.xlu0 %1375, %v847_v43  }
  0x3e   :  { %896 = vperm.xlu1 %1376, %v850_v45  }
  0x3f   :  { %891 = vperm.xlu0 %1375, %v849_v46   ;;  %1315 = vmatmul.mubr.msk.bf16.gmra.mrb[24].mxu0 %vm229_vm2, %v1384_v54 }
  0x40   :  { %366 = vmatprep.mubr.bf16.mxu0 %v1546_v0 }
  0x42   :  { %906 = vperm.xlu1 %1376, %v852_v47  }
  0x43   :  { %901 = vperm.xlu0 %1375, %v851_v48  }
  0x46   :  { %916 = vperm.xlu1 %1376, %v854_v50  }
  0x47   :  { %911 = vperm.xlu0 %1375, %v853_v51   ;;  %1316 = vmatmul.mubr.msk.bf16.gmra.mrb[28].mxu0 %vm229_vm2, %v1385_v58 }
  0x48   :  { %474 = vmatprep.mubr.bf16.mxu0 %v1546_v0 }
  0x4a   :  { %926 = vperm.xlu1 %1376, %v856_v52  }
  0x4b   :  { %921 = vperm.xlu0 %1375, %v855_v53  }
  0x4e   :  { %936 = vperm.xlu1 %1376, %v858_v55  }
  0x4f   :  { %931 = vperm.xlu0 %1375, %v857_v56  }
  0x53   :  { %1248 = vperm.xlu0 %1375, %v1245_v57  }
  0x81   :  { %v91_v3 = vpop.permute.xlu1 %90 }
  0x82   :  { %v48_v4 = vpop.permute.xlu0 %47 }
  0x83   :  { %v76_v5 = vmul.f32 %v69_v1, %v48_v4  ;;  %v77_v6 = vmul.f32 %v73_v2, %v48_v4  ;;  %v1390_v4 = vld [vmem:[%s1979_s5 + $0x20] sm:$0xff]  }
  0x85   :  { %v108_v7 = vadd.f32 %v91_v3, %v76_v5  ;;  %v109_v8 = vadd.f32 %v91_v3, %v77_v6  ;;  %v96_v9 = vpop.permute.xlu1 %95  ;;  %v1389_v3 = vld [vmem:[%s1979_s5 + $0x18] sm:$0xff]   ;;  %v1391_v5 = vld [vmem:[%s1979_s5 + $0x28] sm:$0xff]   ;;  %v1392_v6 = vld [vmem:[%s1979_s5 + $0x30] sm:$0xff]  }
  0x86   :  { %v53_v10 = vpop.permute.xlu0 %52 }
  0x87   :  { %v116_v11 = vmul.f32 0.5, %v108_v7  ;;  %v117_v12 = vmul.f32 0.5, %v109_v8  ;;  %v78_v13 = vmul.f32 %v69_v1, %v53_v10  ;;  %v79_v14 = vmul.f32 %v73_v2, %v53_v10  ;;  %v1393_v7 = vld [vmem:[%s1979_s5 + $0x38] sm:$0xff]  }
  0x89   :  { %1402 = vtanh.f32 %v116_v11  ;;  %v110_v15 = vadd.f32 %v96_v9, %v78_v13  ;;  %v111_v16 = vadd.f32 %v96_v9, %v79_v14  ;;  %v63_v17 = vpop.permute.xlu1 %62 }
  0x8a   :  { %1404 = vtanh.f32 %v117_v12  ;;  %v58_v18 = vpop.permute.xlu0 %57  ;;  %v82_v21 = vmul.f32 %v69_v1, %v63_v17  ;;  %v83_v22 = vmul.f32 %v73_v2, %v63_v17 }
  0x8b   :  { %v118_v19 = vmul.f32 0.5, %v110_v15  ;;  %v119_v20 = vmul.f32 0.5, %v111_v16  ;;  %v80_v23 = vmul.f32 %v69_v1, %v58_v18  ;;  %v81_v24 = vmul.f32 %v73_v2, %v58_v18  ;;  %v1387_v1 = vld [vmem:[%s1979_s5 + $0x8] sm:$0xff]   ;;  %v1388_v2 = vld [vmem:[%s1979_s5 + $0x10] sm:$0xff]  }
  0x8d   :  { %1406 = vtanh.f32 %v118_v19  ;;  %v106_v25 = vpop.permute.xlu1 %105 }
  0x8e   :  { %1408 = vtanh.f32 %v119_v20  ;;  %v101_v26 = vpop.permute.xlu0 %100  ;;  %v114_v27 = vadd.f32 %v106_v25, %v82_v21  ;;  %v115_v28 = vadd.f32 %v106_v25, %v83_v22 }
  0x8f   :  { %v112_v29 = vadd.f32 %v101_v26, %v80_v23  ;;  %v113_v30 = vadd.f32 %v101_v26, %v81_v24 }
  0x90   :  { %v122_v31 = vmul.f32 0.5, %v114_v27  ;;  %v123_v32 = vmul.f32 0.5, %v115_v28 }
  0x91   :  { %v120_v33 = vmul.f32 0.5, %v112_v29  ;;  %v121_v34 = vmul.f32 0.5, %v113_v30 }
  0x92   :  { %1410 = vtanh.f32 %v122_v31  ;;  %v574_v8 = vpop.permute.xlu0 %573 }
  0x93   :  { %v1403_v35 = vpop.eup %1402  ;;  %1412 = vtanh.f32 %v123_v32 }
  0x94   :  { %v1405_v36 = vpop.eup %1404  ;;  %1414 = vtanh.f32 %v120_v33  ;;  %v132_v37 = vadd.f32 1.0, %v1403_v35 }
  0x95   :  { %1416 = vtanh.f32 %v121_v34  ;;  %v133_v39 = vadd.f32 1.0, %v1405_v36 }
  0x96   :  { %v140_v43 = vmul.f32 %v132_v37, %v116_v11  ;;  %v584_v22 = vpop.permute.xlu0 %583 }
  0x97   :  { %v1407_v38 = vpop.eup %1406  ;;  %v141_v45 = vmul.f32 %v133_v39, %v117_v12  ;;  %v579_v12 = vpop.permute.xlu1 %578 }
  0x98   :  { %v1409_v40 = vpop.eup %1408  ;;  %v134_v41 = vadd.f32 1.0, %v1407_v38 }
  0x99   :  { %v135_v42 = vadd.f32 1.0, %v1409_v40 }
  0x9a   :  { %v142_v44 = vmul.f32 %v134_v41, %v118_v19  ;;  %v594_v38 = vpop.permute.xlu0 %593 }
  0x9b   :  { %v143_v46 = vmul.f32 %v135_v42, %v119_v20  ;;  %v589_v26 = vpop.permute.xlu1 %588 }
  0x9c   :  { %v164_v47 = vpack.c.bf16 %v142_v44, %v140_v43  ;;  %v1411_v48 = vpop.eup %1410 }
  0x9d   :  { %v165_v49 = vpack.c.bf16 %v143_v46, %v141_v45  ;;  %v1413_v50 = vpop.eup %1412  ;;  %v138_v51 = vadd.f32 1.0, %v1411_v48 }
  0x9e   :  { %v1415_v52 = vpop.eup %1414  ;;  %v139_v53 = vadd.f32 1.0, %v1413_v50 }
  0x9f   :  { %442 = vmatprep.subr.bf16.mxu0 %v165_v49  ;;  %v1417_v54 = vpop.eup %1416  ;;  %v146_v55 = vmul.f32 %v138_v51, %v122_v31  ;;  %v136_v56 = vadd.f32 1.0, %v1415_v52  ;;  %v599_v46 = vpop.permute.xlu1 %598 }
  0xa0   :  { %443 = vmatpush1.bf16.msra.mxu0 %v164_v47  ;;  %v147_v57 = vmul.f32 %v139_v53, %v123_v32  ;;  %v137_v58 = vadd.f32 1.0, %v1417_v54 }
  0xa1   :  { %v144_v59 = vmul.f32 %v136_v56, %v120_v33 }
  0xa2   :  { %v145_v60 = vmul.f32 %v137_v58, %v121_v34 }
  0xa3   :  { %v166_v61 = vpack.c.bf16 %v146_v55, %v144_v59 }
  0xa4   :  { %v167_v62 = vpack.c.bf16 %v147_v57, %v145_v60 }
  0xa6   :  { %444 = vmatprep.subr.bf16.mxu0 %v167_v62 }
  0xa7   :  { %445 = vmatpush1.bf16.msra.mxu0 %v166_v61 }
  0xaa   :  { %1325 = vmatmul.mubr.msk.bf16.vlgmr.msra.gmra.mrb[0].mxu0 %vm417_vm3, %v1386_v63 }
  0xab   :  { %484 = vmatprep.mubr.bf16.mxu0 %v1546_v0 }
  0xb2   :  { %1326 = vmatmul.mubr.msk.bf16.gmra.mrb[4].mxu0 %vm417_vm3, %v1387_v1 }
  0xb3   :  { %494 = vmatprep.mubr.bf16.mxu0 %v1546_v0 }
  0xba   :  { %1327 = vmatmul.mubr.msk.bf16.gmra.mrb[8].mxu0 %vm417_vm3, %v1388_v2 }
  0xbb   :  { %504 = vmatprep.mubr.bf16.mxu0 %v1546_v0 }
  0xc2   :  { %1328 = vmatmul.mubr.msk.bf16.gmra.mrb[12].mxu0 %vm417_vm3, %v1389_v3  ;;  %v604_v3 = vpop.permute.xlu0 %603 }
  0xc3   :  { %514 = vmatprep.mubr.bf16.mxu0 %v1546_v0 }
  0xca   :  { %1329 = vmatmul.mubr.msk.bf16.gmra.mrb[16].mxu0 %vm417_vm3, %v1390_v4 }
  0xcb   :  { %524 = vmatprep.mubr.bf16.mxu0 %v1546_v0 }
  0xd2   :  { %1330 = vmatmul.mubr.msk.bf16.gmra.mrb[20].mxu0 %vm417_vm3, %v1391_v5 }
  0xd3   :  { %534 = vmatprep.mubr.bf16.mxu0 %v1546_v0 }
  0xda   :  { %1331 = vmatmul.mubr.msk.bf16.gmra.mrb[24].mxu0 %vm417_vm3, %v1392_v6 }
  0xdb   :  { %544 = vmatprep.mubr.bf16.mxu0 %v1546_v0 }
  0xe2   :  { %1332 = vmatmul.mubr.msk.bf16.gmra.mrb[28].mxu0 %vm417_vm3, %v1393_v7 }
 0x17d   :  { %v476_v9 = vpop.f32.mrb[0].mxu0 }
 0x17e   :  { %v651_v10 = vadd.f32 %v574_v8, %v476_v9  ;;  %v478_v11 = vpop.f32.mrb[1].mxu0 }
 0x17f   :  { %v652_v13 = vadd.f32 %v574_v8, %v478_v11  ;;  %v480_v14 = vpop.f32.mrb[2].mxu0  ;;  %v609_v11 = vpop.permute.xlu1 %608 }
 0x180   :  { %v683_v15 = vmul.f32 0.5, %v651_v10  ;;  %v653_v16 = vadd.f32 %v579_v12, %v480_v14  ;;  %v482_v17 = vpop.f32.mrb[3].mxu0 }
 0x181   :  { %v684_v18 = vmul.f32 0.5, %v652_v13  ;;  %v654_v19 = vadd.f32 %v579_v12, %v482_v17 }
 0x182   :  { %1418 = vtanh.f32 %v683_v15  ;;  %v685_v20 = vmul.f32 0.5, %v653_v16 }
 0x183   :  { %1420 = vtanh.f32 %v684_v18  ;;  %v686_v21 = vmul.f32 0.5, %v654_v19 }
 0x184   :  { %1422 = vtanh.f32 %v685_v20 }
 0x185   :  { %1424 = vtanh.f32 %v686_v21  ;;  %v486_v23 = vpop.f32.mrb[4].mxu0 }
 0x186   :  { %v655_v24 = vadd.f32 %v584_v22, %v486_v23  ;;  %v488_v25 = vpop.f32.mrb[5].mxu0 }
 0x187   :  { %v656_v27 = vadd.f32 %v584_v22, %v488_v25  ;;  %v490_v28 = vpop.f32.mrb[6].mxu0 }
 0x188   :  { %v1820_v29 = vmul.f32 0.5, %v655_v24  ;;  %v657_v30 = vadd.f32 %v589_v26, %v490_v28  ;;  %v492_v31 = vpop.f32.mrb[7].mxu0 }
 0x189   :  { %v1822_v32 = vmul.f32 0.5, %v656_v27  ;;  %v658_v33 = vadd.f32 %v589_v26, %v492_v31 }
 0x18a   :  { %1426 = vtanh.f32 %v1820_v29  ;;  %v689_v34 = vmul.f32 0.5, %v657_v30 }
 0x18b   :  { %1428 = vtanh.f32 %v1822_v32  ;;  %v690_v35 = vmul.f32 0.5, %v658_v33 }
 0x18c   :  { %v1419_v36 = vpop.eup %1418  ;;  %1430 = vtanh.f32 %v689_v34 }
 0x18d   :  { %v1421_v37 = vpop.eup %1420  ;;  %v747_v39 = vadd.f32 1.0, %v1419_v36  ;;  %1432 = vtanh.f32 %v690_v35  ;;  %v496_v40 = vpop.f32.mrb[8].mxu0 }
 0x18e   :  { %v1423_v41 = vpop.eup %1422  ;;  %v659_v42 = vadd.f32 %v594_v38, %v496_v40  ;;  %v498_v43 = vpop.f32.mrb[9].mxu0  ;;  %v748_v44 = vadd.f32 1.0, %v1421_v37 }
 0x18f   :  { %v1425_v45 = vpop.eup %1424  ;;  %v749_v47 = vadd.f32 1.0, %v1423_v41  ;;  %v660_v48 = vadd.f32 %v594_v38, %v498_v43  ;;  %v500_v49 = vpop.f32.mrb[10].mxu0  ;;  %v779_v54 = vmul.f32 %v747_v39, %v683_v15 }
 0x190   :  { %v1826_v50 = vmul.f32 0.5, %v659_v42  ;;  %v661_v51 = vadd.f32 %v599_v46, %v500_v49  ;;  %v502_v52 = vpop.f32.mrb[11].mxu0  ;;  %v750_v53 = vadd.f32 1.0, %v1425_v45  ;;  %v780_v59 = vmul.f32 %v748_v44, %v684_v18  ;;  %v619_v39 = vpop.permute.xlu1 %618 }
 0x191   :  { %v781_v55 = vmul.f32 %v749_v47, %v685_v20  ;;  %v1828_v56 = vmul.f32 0.5, %v660_v48  ;;  %v662_v57 = vadd.f32 %v599_v46, %v502_v52 }
 0x192   :  { %1434 = vtanh.f32 %v1826_v50  ;;  %v1831_v58 = vmul.f32 0.5, %v661_v51  ;;  %v782_v60 = vmul.f32 %v750_v53, %v686_v21 }
 0x193   :  { %1436 = vtanh.f32 %v1828_v56  ;;  %v1834_v61 = vmul.f32 0.5, %v662_v57  ;;  %v827_v62 = vpack.c.bf16 %v781_v55, %v779_v54 }
 0x194   :  { %v1427_v63 = vpop.eup %1426  ;;  %1438 = vtanh.f32 %v1831_v58  ;;  %v828_v1 = vpack.c.bf16 %v782_v60, %v780_v59 }
 0x195   :  { %v1429_v2 = vpop.eup %1428  ;;  %v751_v4 = vadd.f32 1.0, %v1427_v63  ;;  %1440 = vtanh.f32 %v1834_v61  ;;  %v506_v5 = vpop.f32.mrb[12].mxu0 }
 0x196   :  { %v1431_v6 = vpop.eup %1430  ;;  %v752_v7 = vadd.f32 1.0, %v1429_v2  ;;  %v663_v8 = vadd.f32 %v604_v3, %v506_v5  ;;  %v508_v9 = vpop.f32.mrb[13].mxu0  ;;  %987 = vmatprep.subr.bf16.mxu1 %v828_v1 }
 0x197   :  { %v1433_v10 = vpop.eup %1432  ;;  %v753_v12 = vadd.f32 1.0, %v1431_v6  ;;  %v664_v13 = vadd.f32 %v604_v3, %v508_v9  ;;  %v510_v14 = vpop.f32.mrb[14].mxu0  ;;  %988 = vmatpush1.bf16.msra.mxu1 %v827_v62  ;;  %v783_v19 = vmul.f32 %v751_v4, %v1820_v29 }
 0x198   :  { %v754_v15 = vadd.f32 1.0, %v1433_v10  ;;  %v1838_v16 = vmul.f32 0.5, %v663_v8  ;;  %v665_v17 = vadd.f32 %v609_v11, %v510_v14  ;;  %v512_v18 = vpop.f32.mrb[15].mxu0  ;;  %v784_v23 = vmul.f32 %v752_v7, %v1822_v32  ;;  %v614_v29 = vpop.permute.xlu0 %613 }
 0x199   :  { %v785_v20 = vmul.f32 %v753_v12, %v689_v34  ;;  %v1841_v21 = vmul.f32 0.5, %v664_v13  ;;  %v666_v22 = vadd.f32 %v609_v11, %v512_v18  ;;  %v629_v4 = vpop.permute.xlu1 %628 }
 0x19a   :  { %v786_v24 = vmul.f32 %v754_v15, %v690_v35  ;;  %1442 = vtanh.f32 %v1838_v16  ;;  %v697_v25 = vmul.f32 0.5, %v665_v17 }
 0x19b   :  { %1444 = vtanh.f32 %v1841_v21  ;;  %v1846_v26 = vmul.f32 0.5, %v666_v22  ;;  %v829_v27 = vpack.c.bf16 %v785_v20, %v783_v19 }
 0x19c   :  { %v1435_v28 = vpop.eup %1434  ;;  %1446 = vtanh.f32 %v697_v25  ;;  %v830_v30 = vpack.c.bf16 %v786_v24, %v784_v23 }
 0x19d   :  { %v1437_v31 = vpop.eup %1436  ;;  %v755_v33 = vadd.f32 1.0, %v1435_v28  ;;  %1448 = vtanh.f32 %v1846_v26  ;;  %v516_v34 = vpop.f32.mrb[16].mxu0 }
 0x19e   :  { %v1439_v36 = vpop.eup %1438  ;;  %v756_v32 = vadd.f32 1.0, %v1437_v31  ;;  %v667_v35 = vadd.f32 %v614_v29, %v516_v34  ;;  %v518_v37 = vpop.f32.mrb[17].mxu0  ;;  %989 = vmatprep.subr.bf16.mxu1 %v830_v30 }
 0x19f   :  { %v1441_v38 = vpop.eup %1440  ;;  %v757_v40 = vadd.f32 1.0, %v1439_v36  ;;  %v668_v41 = vadd.f32 %v614_v29, %v518_v37  ;;  %v520_v42 = vpop.f32.mrb[18].mxu0  ;;  %990 = vmatpush1.bf16.msra.mxu1 %v829_v27  ;;  %v787_v47 = vmul.f32 %v755_v33, %v1826_v50 }
 0x1a0   :  { %v758_v43 = vadd.f32 1.0, %v1441_v38  ;;  %v1849_v44 = vmul.f32 0.5, %v667_v35  ;;  %v669_v45 = vadd.f32 %v619_v39, %v520_v42  ;;  %v522_v46 = vpop.f32.mrb[19].mxu0  ;;  %v788_v52 = vmul.f32 %v756_v32, %v1828_v56  ;;  %v639_v33 = vpop.permute.xlu1 %638 }
 0x1a1   :  { %v789_v48 = vmul.f32 %v757_v40, %v1831_v58  ;;  %v1853_v49 = vmul.f32 0.5, %v668_v41  ;;  %v670_v51 = vadd.f32 %v619_v39, %v522_v46  ;;  %v624_v58 = vpop.permute.xlu0 %623 }
 0x1a2   :  { %v790_v53 = vmul.f32 %v758_v43, %v1834_v61  ;;  %1450 = vtanh.f32 %v1849_v44  ;;  %v701_v54 = vmul.f32 0.5, %v669_v45 }
 0x1a3   :  { %1452 = vtanh.f32 %v1853_v49  ;;  %v1859_v55 = vmul.f32 0.5, %v670_v51  ;;  %v831_v57 = vpack.c.bf16 %v789_v48, %v787_v47 }
 0x1a4   :  { %v1443_v59 = vpop.eup %1442  ;;  %1454 = vtanh.f32 %v701_v54  ;;  %v832_v50 = vpack.c.bf16 %v790_v53, %v788_v52 }
 0x1a5   :  { %v1445_v60 = vpop.eup %1444  ;;  %v759_v62 = vadd.f32 1.0, %v1443_v59  ;;  %1456 = vtanh.f32 %v1859_v55  ;;  %v526_v63 = vpop.f32.mrb[20].mxu0 }
 0x1a6   :  { %v1447_v56 = vpop.eup %1446  ;;  %v760_v1 = vadd.f32 1.0, %v1445_v60  ;;  %v671_v61 = vadd.f32 %v624_v58, %v526_v63  ;;  %v528_v2 = vpop.f32.mrb[21].mxu0  ;;  %991 = vmatprep.subr.bf16.mxu1 %v832_v50 }
 0x1a7   :  { %v1449_v3 = vpop.eup %1448  ;;  %v761_v5 = vadd.f32 1.0, %v1447_v56  ;;  %v672_v6 = vadd.f32 %v624_v58, %v528_v2  ;;  %v530_v7 = vpop.f32.mrb[22].mxu0  ;;  %992 = vmatpush1.bf16.msra.mxu1 %v831_v57  ;;  %v791_v12 = vmul.f32 %v759_v62, %v1838_v16 }
 0x1a8   :  { %v762_v8 = vadd.f32 1.0, %v1449_v3  ;;  %v1862_v9 = vmul.f32 0.5, %v671_v61  ;;  %v673_v10 = vadd.f32 %v629_v4, %v530_v7  ;;  %v532_v11 = vpop.f32.mrb[23].mxu0  ;;  %v792_v17 = vmul.f32 %v760_v1, %v1841_v21 }
 0x1a9   :  { %v793_v13 = vmul.f32 %v761_v5, %v697_v25  ;;  %v1865_v14 = vmul.f32 0.5, %v672_v6  ;;  %v674_v15 = vadd.f32 %v629_v4, %v532_v11  ;;  %v634_v25 = vpop.permute.xlu0 %633 }
 0x1aa   :  { %v794_v18 = vmul.f32 %v762_v8, %v1846_v26  ;;  %1458 = vtanh.f32 %v1862_v9  ;;  %v705_v19 = vmul.f32 0.5, %v673_v10 }
 0x1ab   :  { %1460 = vtanh.f32 %v1865_v14  ;;  %v1871_v20 = vmul.f32 0.5, %v674_v15  ;;  %v833_v22 = vpack.c.bf16 %v793_v13, %v791_v12 }
 0x1ac   :  { %v1451_v23 = vpop.eup %1450  ;;  %1462 = vtanh.f32 %v705_v19  ;;  %v834_v24 = vpack.c.bf16 %v794_v18, %v792_v17 }
 0x1ad   :  { %v1453_v16 = vpop.eup %1452  ;;  %v763_v27 = vadd.f32 1.0, %v1451_v23  ;;  %1464 = vtanh.f32 %v1871_v20  ;;  %v536_v28 = vpop.f32.mrb[24].mxu0 }
 0x1ae   :  { %v1455_v21 = vpop.eup %1454  ;;  %v764_v30 = vadd.f32 1.0, %v1453_v16  ;;  %v675_v26 = vadd.f32 %v634_v25, %v536_v28  ;;  %v538_v31 = vpop.f32.mrb[25].mxu0  ;;  %993 = vmatprep.subr.bf16.mxu1 %v834_v24 }
 0x1af   :  { %v1457_v29 = vpop.eup %1456  ;;  %v765_v34 = vadd.f32 1.0, %v1455_v21  ;;  %v676_v36 = vadd.f32 %v634_v25, %v538_v31  ;;  %v540_v32 = vpop.f32.mrb[26].mxu0  ;;  %994 = vmatpush1.bf16.msra.mxu1 %v833_v22  ;;  %v795_v40 = vmul.f32 %v763_v27, %v1849_v44 }
 0x1b0   :  { %v766_v35 = vadd.f32 1.0, %v1457_v29  ;;  %v707_v37 = vmul.f32 0.5, %v675_v26  ;;  %v677_v38 = vadd.f32 %v639_v33, %v540_v32  ;;  %v542_v39 = vpop.f32.mrb[27].mxu0  ;;  %v796_v45 = vmul.f32 %v764_v30, %v1853_v49  ;;  %v644_v59 = vpop.permute.xlu0 %643 }
 0x1b1   :  { %v797_v41 = vmul.f32 %v765_v34, %v701_v54  ;;  %v708_v42 = vmul.f32 0.5, %v676_v36  ;;  %v678_v43 = vadd.f32 %v639_v33, %v542_v39 }
 0x1b2   :  { %v798_v46 = vmul.f32 %v766_v35, %v1859_v55  ;;  %1466 = vtanh.f32 %v707_v37  ;;  %v709_v47 = vmul.f32 0.5, %v677_v38  ;;  %v649_v55 = vpop.permute.xlu1 %648 }
 0x1b3   :  { %1468 = vtanh.f32 %v708_v42  ;;  %v710_v48 = vmul.f32 0.5, %v678_v43  ;;  %v835_v51 = vpack.c.bf16 %v797_v41, %v795_v40 }
 0x1b4   :  { %v1459_v52 = vpop.eup %1458  ;;  %1470 = vtanh.f32 %v709_v47  ;;  %v836_v53 = vpack.c.bf16 %v798_v46, %v796_v45  ;;  %v1395_v45 = vld [vmem:[%s1983_s7 + $0x8] sm:$0xff]   ;;  %v1396_v46 = vld [vmem:[%s1983_s7 + $0x10] sm:$0xff]  }
 0x1b5   :  { %v1461_v57 = vpop.eup %1460  ;;  %v767_v50 = vadd.f32 1.0, %v1459_v52  ;;  %1472 = vtanh.f32 %v710_v48  ;;  %v546_v44 = vpop.f32.mrb[28].mxu0  ;;  %v1400_v52 = vld [vmem:[%s1983_s7 + $0x30] sm:$0xff]  }
 0x1b6   :  { %v1463_v54 = vpop.eup %1462  ;;  %v768_v60 = vadd.f32 1.0, %v1461_v57  ;;  %v679_v58 = vadd.f32 %v644_v59, %v546_v44  ;;  %v548_v62 = vpop.f32.mrb[29].mxu0  ;;  %995 = vmatprep.subr.bf16.mxu1 %v836_v53  ;;  %v1401_v53 = vld [vmem:[%s1983_s7 + $0x38] sm:$0xff]  }
 0x1b7   :  { %v1465_v49 = vpop.eup %1464  ;;  %v769_v63 = vadd.f32 1.0, %v1463_v54  ;;  %v680_v56 = vadd.f32 %v644_v59, %v548_v62  ;;  %v550_v1 = vpop.f32.mrb[30].mxu0  ;;  %996 = vmatpush1.bf16.msra.mxu1 %v835_v51  ;;  %v799_v5 = vmul.f32 %v767_v50, %v1862_v9  ;;  %v1399_v51 = vld [vmem:[%s1983_s7 + $0x28] sm:$0xff]  }
 0x1b8   :  { %v770_v61 = vadd.f32 1.0, %v1465_v49  ;;  %v711_v2 = vmul.f32 0.5, %v679_v58  ;;  %v681_v3 = vadd.f32 %v649_v55, %v550_v1  ;;  %v552_v4 = vpop.f32.mrb[31].mxu0  ;;  %v800_v10 = vmul.f32 %v768_v60, %v1865_v14  ;;  %v862_v57 = vpop.permute.xlu0 %861 }
 0x1b9   :  { %v801_v6 = vmul.f32 %v769_v63, %v705_v19  ;;  %v712_v7 = vmul.f32 0.5, %v680_v56  ;;  %v682_v8 = vadd.f32 %v649_v55, %v552_v4  ;;  %v867_v54 = vpop.permute.xlu1 %866 }
 0x1ba   :  { %v802_v11 = vmul.f32 %v770_v61, %v1871_v20  ;;  %1474 = vtanh.f32 %v711_v2  ;;  %v713_v12 = vmul.f32 0.5, %v681_v3 }
 0x1bb   :  { %1476 = vtanh.f32 %v712_v7  ;;  %v714_v13 = vmul.f32 0.5, %v682_v8  ;;  %v837_v15 = vpack.c.bf16 %v801_v6, %v799_v5 }
 0x1bc   :  { %v1467_v17 = vpop.eup %1466  ;;  %1478 = vtanh.f32 %v713_v12  ;;  %v838_v18 = vpack.c.bf16 %v802_v11, %v800_v10 }
 0x1bd   :  { %v1469_v22 = vpop.eup %1468  ;;  %v771_v23 = vadd.f32 1.0, %v1467_v17  ;;  %1480 = vtanh.f32 %v714_v13  ;;  %v877_v5 = vpop.permute.xlu1 %876 }
 0x1be   :  { %v1471_v24 = vpop.eup %1470  ;;  %v772_v9 = vadd.f32 1.0, %v1469_v22  ;;  %997 = vmatprep.subr.bf16.mxu1 %v838_v18 }
 0x1bf   :  { %v1473_v19 = vpop.eup %1472  ;;  %v773_v16 = vadd.f32 1.0, %v1471_v24  ;;  %998 = vmatpush1.bf16.msra.mxu1 %v837_v15  ;;  %v803_v25 = vmul.f32 %v771_v23, %v707_v37 }
 0x1c0   :  { %v774_v14 = vadd.f32 1.0, %v1473_v19  ;;  %v804_v27 = vmul.f32 %v772_v9, %v708_v42  ;;  %v1394_v42 = vld [vmem:[%s1983_s7] sm:$0xff]  }
 0x1c1   :  { %v805_v20 = vmul.f32 %v773_v16, %v709_v47  ;;  %v1397_v47 = vld [vmem:[%s1983_s7 + $0x18] sm:$0xff]  }
 0x1c2   :  { %v806_v28 = vmul.f32 %v774_v14, %v710_v48  ;;  %v1398_v48 = vld [vmem:[%s1983_s7 + $0x20] sm:$0xff]  }
 0x1c3   :  { %v839_v21 = vpack.c.bf16 %v805_v20, %v803_v25 }
 0x1c4   :  { %v1475_v30 = vpop.eup %1474  ;;  %v840_v26 = vpack.c.bf16 %v806_v28, %v804_v27  ;;  %v887_v27 = vpop.permute.xlu1 %886 }
 0x1c5   :  { %v1477_v31 = vpop.eup %1476  ;;  %v775_v29 = vadd.f32 1.0, %v1475_v30 }
 0x1c6   :  { %v1479_v33 = vpop.eup %1478  ;;  %v776_v34 = vadd.f32 1.0, %v1477_v31  ;;  %999 = vmatprep.subr.bf16.mxu1 %v840_v26 }
 0x1c7   :  { %v1481_v36 = vpop.eup %1480  ;;  %v777_v32 = vadd.f32 1.0, %v1479_v33  ;;  %1000 = vmatpush1.bf16.msra.mxu1 %v839_v21  ;;  %v807_v38 = vmul.f32 %v775_v29, %v711_v2  ;;  %v872_v2 = vpop.permute.xlu0 %871 }
 0x1c8   :  { %v778_v35 = vadd.f32 1.0, %v1481_v36  ;;  %v808_v40 = vmul.f32 %v776_v34, %v712_v7 }
 0x1c9   :  { %v809_v39 = vmul.f32 %v777_v32, %v713_v12 }
 0x1ca   :  { %v810_v41 = vmul.f32 %v778_v35, %v714_v13 }
 0x1cb   :  { %v841_v37 = vpack.c.bf16 %v809_v39, %v807_v38  ;;  %v882_v23 = vpop.permute.xlu0 %881 }
 0x1cc   :  { %v842_v43 = vpack.c.bf16 %v810_v41, %v808_v40 }
 0x1ce   :  { %1001 = vmatprep.subr.bf16.mxu1 %v842_v43 }
 0x1cf   :  { %1002 = vmatpush1.bf16.msra.mxu1 %v841_v37 }
 0x1d2   :  { %1020 = vmatmul.mubr.bf16.vlgmr.msra.gmra.mrb[0].mxu1 %v1394_v42 }
 0x1d3   :  { %1029 = vmatprep.mubr.bf16.mxu1 %v1546_v0 }
 0x1da   :  { %1030 = vmatmul.mubr.bf16.gmra.mrb[4].mxu1 %v1395_v45 }
 0x1db   :  { %1039 = vmatprep.mubr.bf16.mxu1 %v1546_v0 }
 0x1e2   :  { %1040 = vmatmul.mubr.bf16.gmra.mrb[8].mxu1 %v1396_v46  ;;  %v892_v46 = vpop.permute.xlu0 %891 }
 0x1e3   :  { %1049 = vmatprep.mubr.bf16.mxu1 %v1546_v0 }
 0x1ea   :  { %1050 = vmatmul.mubr.bf16.gmra.mrb[12].mxu1 %v1397_v47 }
 0x1eb   :  { %1059 = vmatprep.mubr.bf16.mxu1 %v1546_v0 }
 0x1f2   :  { %1060 = vmatmul.mubr.bf16.gmra.mrb[16].mxu1 %v1398_v48 }
 0x1f3   :  { %1069 = vmatprep.mubr.bf16.mxu1 %v1546_v0 }
 0x1fa   :  { %1070 = vmatmul.mubr.bf16.gmra.mrb[20].mxu1 %v1399_v51 }
 0x1fb   :  { %1079 = vmatprep.mubr.bf16.mxu1 %v1546_v0 }
 0x202   :  { %1080 = vmatmul.mubr.bf16.gmra.mrb[24].mxu1 %v1400_v52 }
 0x203   :  { %1089 = vmatprep.mubr.bf16.mxu1 %v1546_v0 }
 0x20a   :  { %1090 = vmatmul.mubr.bf16.gmra.mrb[28].mxu1 %v1401_v53 }
 0x20b   :  { %1283 = vmatprep.mubr.bf16.mxu1 %v1546_v0 }
 0x2a5   :  { %v1021_v59 = vpop.f32.mrb[0].mxu1 }
 0x2a6   :  { %v1022_v50 = vadd.f32 %v1021_v59, %v862_v57  ;;  %v1023_v44 = vpop.f32.mrb[1].mxu1 }
 0x2a7   :  { %v1024_v60 = vadd.f32 %v1023_v44, %v862_v57  ;;  %v1025_v58 = vpop.f32.mrb[2].mxu1 }
 0x2a8   :  { %v1100_v62 = vmul.f32 0.5, %v1022_v50  ;;  %v1026_v49 = vadd.f32 %v1025_v58, %v867_v54  ;;  %v1027_v55 = vpop.f32.mrb[3].mxu1  ;;  %v897_v50 = vpop.permute.xlu1 %896 }
 0x2a9   :  { %v1101_v63 = vmul.f32 0.5, %v1024_v60  ;;  %v1028_v56 = vadd.f32 %v1027_v55, %v867_v54 }
 0x2aa   :  { %1482 = vtanh.f32 %v1100_v62  ;;  %v1102_v1 = vmul.f32 0.5, %v1026_v49 }
 0x2ab   :  { %1484 = vtanh.f32 %v1101_v63  ;;  %v1103_v61 = vmul.f32 0.5, %v1028_v56 }
 0x2ac   :  { %1486 = vtanh.f32 %v1102_v1 }
 0x2ad   :  { %1488 = vtanh.f32 %v1103_v61  ;;  %v1031_v0 = vpop.f32.mrb[4].mxu1 }
 0x2ae   :  { %v1032_v3 = vadd.f32 %v1031_v0, %v872_v2  ;;  %v1033_v4 = vpop.f32.mrb[5].mxu1 }
 0x2af   :  { %v1034_v6 = vadd.f32 %v1033_v4, %v872_v2  ;;  %v1035_v7 = vpop.f32.mrb[6].mxu1 }
 0x2b0   :  { %v1912_v8 = vmul.f32 0.5, %v1032_v3  ;;  %v1036_v10 = vadd.f32 %v1035_v7, %v877_v5  ;;  %v1037_v11 = vpop.f32.mrb[7].mxu1 }
 0x2b1   :  { %v1914_v12 = vmul.f32 0.5, %v1034_v6  ;;  %v1038_v13 = vadd.f32 %v1037_v11, %v877_v5 }
 0x2b2   :  { %1490 = vtanh.f32 %v1912_v8  ;;  %v1106_v15 = vmul.f32 0.5, %v1036_v10 }
 0x2b3   :  { %1492 = vtanh.f32 %v1914_v12  ;;  %v1107_v17 = vmul.f32 0.5, %v1038_v13 }
 0x2b4   :  { %v1483_v18 = vpop.eup %1482  ;;  %1494 = vtanh.f32 %v1106_v15 }
 0x2b5   :  { %v1485_v22 = vpop.eup %1484  ;;  %v1164_v24 = vadd.f32 1.0, %v1483_v18  ;;  %1496 = vtanh.f32 %v1107_v17  ;;  %v1041_v9 = vpop.f32.mrb[8].mxu1 }
 0x2b6   :  { %v1487_v19 = vpop.eup %1486  ;;  %v1165_v16 = vadd.f32 1.0, %v1485_v22  ;;  %v1042_v14 = vadd.f32 %v1041_v9, %v882_v23  ;;  %v1043_v25 = vpop.f32.mrb[9].mxu1 }
 0x2b7   :  { %v1489_v20 = vpop.eup %1488  ;;  %v1166_v28 = vadd.f32 1.0, %v1487_v19  ;;  %v1044_v21 = vadd.f32 %v1043_v25, %v882_v23  ;;  %v1045_v30 = vpop.f32.mrb[10].mxu1  ;;  %v1196_v34 = vmul.f32 %v1164_v24, %v1100_v62 }
 0x2b8   :  { %v1167_v26 = vadd.f32 1.0, %v1489_v20  ;;  %v1918_v31 = vmul.f32 0.5, %v1042_v14  ;;  %v1046_v29 = vadd.f32 %v1045_v30, %v887_v27  ;;  %v1047_v33 = vpop.f32.mrb[11].mxu1  ;;  %v1197_v38 = vmul.f32 %v1165_v16, %v1101_v63  ;;  %v907_v23 = vpop.permute.xlu1 %906 }
 0x2b9   :  { %v1198_v36 = vmul.f32 %v1166_v28, %v1102_v1  ;;  %v1920_v32 = vmul.f32 0.5, %v1044_v21  ;;  %v1048_v35 = vadd.f32 %v1047_v33, %v887_v27 }
 0x2ba   :  { %v1199_v39 = vmul.f32 %v1167_v26, %v1103_v61  ;;  %1498 = vtanh.f32 %v1918_v31  ;;  %v1110_v40 = vmul.f32 0.5, %v1046_v29 }
 0x2bb   :  { %v1229_v41 = vpack.c.bf16 %v1198_v36, %v1196_v34  ;;  %1500 = vtanh.f32 %v1920_v32  ;;  %v1924_v37 = vmul.f32 0.5, %v1048_v35 }
 0x2bc   :  { %v1491_v43 = vpop.eup %1490  ;;  %1502 = vtanh.f32 %v1110_v40  ;;  %v1230_v42 = vpack.c.bf16 %v1199_v39, %v1197_v38 }
 0x2bd   :  { %v1493_v45 = vpop.eup %1492  ;;  %v1168_v47 = vadd.f32 1.0, %v1491_v43  ;;  %1504 = vtanh.f32 %v1924_v37  ;;  %v1051_v48 = vpop.f32.mrb[12].mxu1 }
 0x2be   :  { %v1495_v51 = vpop.eup %1494  ;;  %v1169_v52 = vadd.f32 1.0, %v1493_v45  ;;  %v1052_v53 = vadd.f32 %v1051_v48, %v892_v46  ;;  %v1053_v57 = vpop.f32.mrb[13].mxu1  ;;  %1251 = vmatprep.subr.bf16.mxu1 %v1230_v42 }
 0x2bf   :  { %v1497_v59 = vpop.eup %1496  ;;  %v1170_v44 = vadd.f32 1.0, %v1495_v51  ;;  %v1054_v54 = vadd.f32 %v1053_v57, %v892_v46  ;;  %v1055_v60 = vpop.f32.mrb[14].mxu1  ;;  %1252 = vmatpush1.bf16.msra.mxu1 %v1229_v41  ;;  %v1200_v63 = vmul.f32 %v1168_v47, %v1912_v8 }
 0x2c0   :  { %v1171_v58 = vadd.f32 1.0, %v1497_v59  ;;  %v1927_v62 = vmul.f32 0.5, %v1052_v53  ;;  %v1056_v49 = vadd.f32 %v1055_v60, %v897_v50  ;;  %v1057_v55 = vpop.f32.mrb[15].mxu1  ;;  %v1201_v2 = vmul.f32 %v1169_v52, %v1914_v12  ;;  %v902_v8 = vpop.permute.xlu0 %901 }
 0x2c1   :  { %v1202_v56 = vmul.f32 %v1170_v44, %v1106_v15  ;;  %v1930_v1 = vmul.f32 0.5, %v1054_v54  ;;  %v1058_v61 = vadd.f32 %v1057_v55, %v897_v50  ;;  %v917_v46 = vpop.permute.xlu1 %916 }
 0x2c2   :  { %v1203_v0 = vmul.f32 %v1171_v58, %v1107_v17  ;;  %1506 = vtanh.f32 %v1927_v62  ;;  %v1114_v3 = vmul.f32 0.5, %v1056_v49 }
 0x2c3   :  { %v1231_v4 = vpack.c.bf16 %v1202_v56, %v1200_v63  ;;  %1508 = vtanh.f32 %v1930_v1  ;;  %v1935_v5 = vmul.f32 0.5, %v1058_v61 }
 0x2c4   :  { %v1499_v6 = vpop.eup %1498  ;;  %1510 = vtanh.f32 %v1114_v3  ;;  %v1232_v7 = vpack.c.bf16 %v1203_v0, %v1201_v2  ;;  %v912_v39 = vpop.permute.xlu0 %911 }
 0x2c5   :  { %v1501_v10 = vpop.eup %1500  ;;  %v1172_v11 = vadd.f32 1.0, %v1499_v6  ;;  %1512 = vtanh.f32 %v1935_v5  ;;  %v1061_v13 = vpop.f32.mrb[16].mxu1 }
 0x2c6   :  { %v1503_v15 = vpop.eup %1502  ;;  %v1173_v12 = vadd.f32 1.0, %v1501_v10  ;;  %v1062_v17 = vadd.f32 %v1061_v13, %v902_v8  ;;  %v1063_v18 = vpop.f32.mrb[17].mxu1  ;;  %1253 = vmatprep.subr.bf16.mxu1 %v1232_v7 }
 0x2c7   :  { %v1505_v22 = vpop.eup %1504  ;;  %v1174_v24 = vadd.f32 1.0, %v1503_v15  ;;  %v1064_v9 = vadd.f32 %v1063_v18, %v902_v8  ;;  %v1065_v19 = vpop.f32.mrb[18].mxu1  ;;  %1254 = vmatpush1.bf16.msra.mxu1 %v1231_v4  ;;  %v1204_v27 = vmul.f32 %v1172_v11, %v1918_v31 }
 0x2c8   :  { %v1175_v16 = vadd.f32 1.0, %v1505_v22  ;;  %v1938_v14 = vmul.f32 0.5, %v1062_v17  ;;  %v1066_v25 = vadd.f32 %v1065_v19, %v907_v23  ;;  %v1067_v20 = vpop.f32.mrb[19].mxu1  ;;  %v1205_v26 = vmul.f32 %v1173_v12, %v1920_v32  ;;  %v922_v0 = vpop.permute.xlu0 %921 }
 0x2c9   :  { %v1206_v28 = vmul.f32 %v1174_v24, %v1110_v40  ;;  %v1941_v21 = vmul.f32 0.5, %v1064_v9  ;;  %v1068_v30 = vadd.f32 %v1067_v20, %v907_v23  ;;  %v927_v8 = vpop.permute.xlu1 %926 }
 0x2ca   :  { %v1207_v29 = vmul.f32 %v1175_v16, %v1924_v37  ;;  %1514 = vtanh.f32 %v1938_v14  ;;  %v1118_v33 = vmul.f32 0.5, %v1066_v25 }
 0x2cb   :  { %v1233_v34 = vpack.c.bf16 %v1206_v28, %v1204_v27  ;;  %1516 = vtanh.f32 %v1941_v21  ;;  %v1947_v36 = vmul.f32 0.5, %v1068_v30 }
 0x2cc   :  { %v1507_v35 = vpop.eup %1506  ;;  %1518 = vtanh.f32 %v1118_v33  ;;  %v1234_v38 = vpack.c.bf16 %v1207_v29, %v1205_v26 }
 0x2cd   :  { %v1509_v31 = vpop.eup %1508  ;;  %v1176_v40 = vadd.f32 1.0, %v1507_v35  ;;  %1520 = vtanh.f32 %v1947_v36  ;;  %v1071_v41 = vpop.f32.mrb[20].mxu1 }
 0x2ce   :  { %v1511_v32 = vpop.eup %1510  ;;  %v1177_v43 = vadd.f32 1.0, %v1509_v31  ;;  %v1072_v37 = vadd.f32 %v1071_v41, %v912_v39  ;;  %v1073_v42 = vpop.f32.mrb[21].mxu1  ;;  %1255 = vmatprep.subr.bf16.mxu1 %v1234_v38 }
 0x2cf   :  { %v1513_v45 = vpop.eup %1512  ;;  %v1178_v47 = vadd.f32 1.0, %v1511_v32  ;;  %v1074_v48 = vadd.f32 %v1073_v42, %v912_v39  ;;  %v1075_v51 = vpop.f32.mrb[22].mxu1  ;;  %1256 = vmatpush1.bf16.msra.mxu1 %v1233_v34  ;;  %v1208_v50 = vmul.f32 %v1176_v40, %v1927_v62 }
 0x2d0   :  { %v1179_v52 = vadd.f32 1.0, %v1513_v45  ;;  %v1950_v53 = vmul.f32 0.5, %v1072_v37  ;;  %v1076_v57 = vadd.f32 %v1075_v51, %v917_v46  ;;  %v1077_v59 = vpop.f32.mrb[23].mxu1  ;;  %v1209_v58 = vmul.f32 %v1177_v43, %v1930_v1  ;;  %v932_v34 = vpop.permute.xlu0 %931 }
 0x2d1   :  { %v1210_v44 = vmul.f32 %v1178_v47, %v1114_v3  ;;  %v1953_v54 = vmul.f32 0.5, %v1074_v48  ;;  %v1078_v60 = vadd.f32 %v1077_v59, %v917_v46 }
 0x2d2   :  { %v1211_v49 = vmul.f32 %v1179_v52, %v1935_v5  ;;  %1522 = vtanh.f32 %v1950_v53  ;;  %v1122_v55 = vmul.f32 0.5, %v1076_v57 }
 0x2d3   :  { %v1235_v63 = vpack.c.bf16 %v1210_v44, %v1208_v50  ;;  %1524 = vtanh.f32 %v1953_v54  ;;  %v1959_v56 = vmul.f32 0.5, %v1078_v60 }
 0x2d4   :  { %v1515_v61 = vpop.eup %1514  ;;  %1526 = vtanh.f32 %v1122_v55  ;;  %v1236_v2 = vpack.c.bf16 %v1211_v49, %v1209_v58 }
 0x2d5   :  { %v1517_v62 = vpop.eup %1516  ;;  %v1180_v3 = vadd.f32 1.0, %v1515_v61  ;;  %1528 = vtanh.f32 %v1959_v56  ;;  %v1081_v4 = vpop.f32.mrb[24].mxu1 }
 0x2d6   :  { %v1519_v1 = vpop.eup %1518  ;;  %v1181_v6 = vadd.f32 1.0, %v1517_v62  ;;  %v1082_v5 = vadd.f32 %v1081_v4, %v922_v0  ;;  %v1083_v7 = vpop.f32.mrb[25].mxu1  ;;  %1257 = vmatprep.subr.bf16.mxu1 %v1236_v2 }
 0x2d7   :  { %v1521_v10 = vpop.eup %1520  ;;  %v1182_v11 = vadd.f32 1.0, %v1519_v1  ;;  %v1084_v13 = vadd.f32 %v1083_v7, %v922_v0  ;;  %v1085_v15 = vpop.f32.mrb[26].mxu1  ;;  %1258 = vmatpush1.bf16.msra.mxu1 %v1235_v63  ;;  %v1212_v23 = vmul.f32 %v1180_v3, %v1938_v14 }
 0x2d8   :  { %v1183_v12 = vadd.f32 1.0, %v1521_v10  ;;  %v1124_v17 = vmul.f32 0.5, %v1082_v5  ;;  %v1086_v18 = vadd.f32 %v1085_v15, %v927_v8  ;;  %v1087_v22 = vpop.f32.mrb[27].mxu1  ;;  %v1213_v16 = vmul.f32 %v1181_v6, %v1941_v21 }
 0x2d9   :  { %v1214_v24 = vmul.f32 %v1182_v11, %v1118_v33  ;;  %v1125_v9 = vmul.f32 0.5, %v1084_v13  ;;  %v1088_v19 = vadd.f32 %v1087_v22, %v927_v8 }
 0x2da   :  { %v1215_v25 = vmul.f32 %v1183_v12, %v1947_v36  ;;  %1530 = vtanh.f32 %v1124_v17  ;;  %v1126_v20 = vmul.f32 0.5, %v1086_v18  ;;  %v937_v36 = vpop.permute.xlu1 %936 }
 0x2db   :  { %v1237_v27 = vpack.c.bf16 %v1214_v24, %v1212_v23  ;;  %1532 = vtanh.f32 %v1125_v9  ;;  %v1127_v28 = vmul.f32 0.5, %v1088_v19  ;;  %v1249_v19 = vpop.permute.xlu0 %1248 }
 0x2dc   :  { %v1523_v30 = vpop.eup %1522  ;;  %1534 = vtanh.f32 %v1126_v20  ;;  %v1238_v26 = vpack.c.bf16 %v1215_v25, %v1213_v16 }
 0x2dd   :  { %v1525_v29 = vpop.eup %1524  ;;  %v1184_v35 = vadd.f32 1.0, %v1523_v30  ;;  %1536 = vtanh.f32 %v1127_v28  ;;  %v1091_v14 = vpop.f32.mrb[28].mxu1 }
 0x2de   :  { %v1527_v33 = vpop.eup %1526  ;;  %v1185_v38 = vadd.f32 1.0, %v1525_v29  ;;  %v1092_v31 = vadd.f32 %v1091_v14, %v932_v34  ;;  %v1093_v39 = vpop.f32.mrb[29].mxu1  ;;  %1259 = vmatprep.subr.bf16.mxu1 %v1238_v26 }
 0x2df   :  { %v1529_v21 = vpop.eup %1528  ;;  %v1186_v40 = vadd.f32 1.0, %v1527_v33  ;;  %v1094_v41 = vadd.f32 %v1093_v39, %v932_v34  ;;  %v1095_v32 = vpop.f32.mrb[30].mxu1  ;;  %1260 = vmatpush1.bf16.msra.mxu1 %v1237_v27  ;;  %v1216_v46 = vmul.f32 %v1184_v35, %v1950_v53 }
 0x2e0   :  { %v1187_v43 = vadd.f32 1.0, %v1529_v21  ;;  %v1128_v37 = vmul.f32 0.5, %v1092_v31  ;;  %v1096_v42 = vadd.f32 %v1095_v32, %v937_v36  ;;  %v1097_v45 = vpop.f32.mrb[31].mxu1  ;;  %v1217_v52 = vmul.f32 %v1185_v38, %v1953_v54 }
 0x2e1   :  { %v1218_v47 = vmul.f32 %v1186_v40, %v1122_v55  ;;  %v1129_v48 = vmul.f32 0.5, %v1094_v41  ;;  %v1098_v51 = vadd.f32 %v1097_v45, %v937_v36 }
 0x2e2   :  { %v1219_v57 = vmul.f32 %v1187_v43, %v1959_v56  ;;  %1538 = vtanh.f32 %v1128_v37  ;;  %v1130_v59 = vmul.f32 0.5, %v1096_v42 }
 0x2e3   :  { %v1239_v50 = vpack.c.bf16 %v1218_v47, %v1216_v46  ;;  %1540 = vtanh.f32 %v1129_v48  ;;  %v1131_v44 = vmul.f32 0.5, %v1098_v51 }
 0x2e4   :  { %v1531_v60 = vpop.eup %1530  ;;  %1542 = vtanh.f32 %v1130_v59  ;;  %v1240_v58 = vpack.c.bf16 %v1219_v57, %v1217_v52 }
 0x2e5   :  { %v1533_v49 = vpop.eup %1532  ;;  %v1188_v63 = vadd.f32 1.0, %v1531_v60  ;;  %1544 = vtanh.f32 %v1131_v44 }
 0x2e6   :  { %v1535_v61 = vpop.eup %1534  ;;  %v1189_v53 = vadd.f32 1.0, %v1533_v49  ;;  %1261 = vmatprep.subr.bf16.mxu1 %v1240_v58 }
 0x2e7   :  { %v1537_v55 = vpop.eup %1536  ;;  %v1190_v2 = vadd.f32 1.0, %v1535_v61  ;;  %1262 = vmatpush1.bf16.msra.mxu1 %v1239_v50  ;;  %v1220_v62 = vmul.f32 %v1188_v63, %v1124_v17 }
 0x2e8   :  { %v1191_v54 = vadd.f32 1.0, %v1537_v55  ;;  %v1221_v0 = vmul.f32 %v1189_v53, %v1125_v9  ;;  %v1228_v9 = vld [vmem:[%s1984_s9] sm:$0x3] }
 0x2e9   :  { %v1222_v56 = vmul.f32 %v1190_v2, %v1126_v20 }
 0x2ea   :  { %v1223_v3 = vmul.f32 %v1191_v54, %v1127_v28 }
 0x2eb   :  { %v1241_v4 = vpack.c.bf16 %v1222_v56, %v1220_v62 }
 0x2ec   :  { %v1539_v1 = vpop.eup %1538  ;;  %v1242_v6 = vpack.c.bf16 %v1223_v3, %v1221_v0 }
 0x2ed   :  { %v1541_v5 = vpop.eup %1540  ;;  %v1192_v7 = vadd.f32 1.0, %v1539_v1 }
 0x2ee   :  { %v1543_v10 = vpop.eup %1542  ;;  %v1193_v8 = vadd.f32 1.0, %v1541_v5  ;;  %1263 = vmatprep.subr.bf16.mxu1 %v1242_v6 }
 0x2ef   :  { %v1545_v11 = vpop.eup %1544  ;;  %v1194_v13 = vadd.f32 1.0, %v1543_v10  ;;  %1264 = vmatpush1.bf16.msra.mxu1 %v1241_v4  ;;  %v1224_v12 = vmul.f32 %v1192_v7, %v1128_v37 }
 0x2f0   :  { %v1195_v15 = vadd.f32 1.0, %v1545_v11  ;;  %v1225_v22 = vmul.f32 %v1193_v8, %v1129_v48 }
 0x2f1   :  { %v1226_v18 = vmul.f32 %v1194_v13, %v1130_v59 }
 0x2f2   :  { %v1227_v23 = vmul.f32 %v1195_v15, %v1131_v44 }
 0x2f3   :  { %v1243_v17 = vpack.c.bf16 %v1226_v18, %v1224_v12 }
 0x2f4   :  { %v1244_v24 = vpack.c.bf16 %v1227_v23, %v1225_v22 }
 0x2f6   :  { %1265 = vmatprep.subr.bf16.mxu1 %v1244_v24 }
 0x2f7   :  { %1266 = vmatpush1.bf16.msra.mxu1 %v1243_v17 }
 0x2fa   :  { %1284 = vmatmul.mubr.bf16.vlgmr.msra.gmra.mrb[32].mxu1 %v1228_v9 }
 0x3cd   :  { %v1285_v16 = vpop.f32.mrb[32].mxu1 }
 0x3ce   :  { %v1286_v25 = vadd.f32 %v1285_v16, %v1249_v19  ;;  %v1287_v20 = vpop.f32.mrb[33].mxu1 }
 0x3cf   :  { %v1288_v27 = vadd.f32 %v1287_v20, %v1249_v19  ;;  %v1289_v28 = vpop.f32.mrb[34].mxu1 }
 0x3d0   :  { %v1290_v30 = vpop.f32.mrb[35].mxu1 }
 0x3d1   :  { %v1294_v26 = vcombine.low %v1286_v25, %v1288_v27 }
 0x3d3   :  { %1296 = vst [vmem:[%s1985_s11] sm:$0x77] %v1294_v26 }

</bundles_post_ra>
